<compile_context>
chip_gen: v7x
topology: tpu7x:2x2x1
jax: 0.10.0
libtpu: 0.0.40
codegen_flags: <defaults>
</compile_context>

<pallas_src>
import jax
import jax.numpy as jnp
from jax.experimental import pallas as pl
from jax.experimental.pallas import tpu as pltpu


def _round_up(x, m):
    return ((x + m - 1) // m) * m


def _make_kernel(bt, total_b, n_lane_groups, mask_rows):
    """Builds the per-block squared-error partial-sum kernel (static config baked in)."""

    def kernel(pd_ref, gt_ref, out_ref):
        # pd_ref, gt_ref : (bt, N) VMEM tiles in their native dtype (lane-dense N)
        pd = pd_ref[...].astype(jnp.float32)
        gt = gt_ref[...].astype(jnp.float32)
        diff = pd - gt

        if mask_rows:
            # The last block may extend past B; those VMEM rows hold garbage, so
            # zero the diff (not just one operand) before squaring.  VPU has huge
            # slack in this memory-bound kernel, so the mask is effectively free.
            row = jax.lax.broadcasted_iota(jnp.int32, diff.shape, 0)
            valid = total_b - pl.program_id(0) * bt
            diff = jnp.where(row < valid, diff, 0.0)

        sq = diff * diff  # (bt, N) f32

        if n_lane_groups is not None:
            # N % 128 == 0: fold the lane axis into one 128-lane group with VPU adds
            # (slices are 128-lane aligned -> no relayout), then one cross-sublane
            # reduce, and store a lane-dense (1, 128) partial (unmasked store).
            acc = sq[:, 0:128]
            for k in range(1, n_lane_groups):
                acc = acc + sq[:, k * 128:(k + 1) * 128]
            out_ref[...] = jnp.sum(acc, axis=0, keepdims=True)[None]
        else:
            # Fallback for N not a multiple of 128: scalar partial per step.
            out_ref[0, 0, 0] = jnp.sum(sq)

    return kernel


def distance_prediction_loss(pd_contacts, gt_contacts):
    """pd_contacts: (B, Hp, Wp); gt_contacts: (B, Hg, Wg) -> scalar f32 loss."""
    B, Hp, Wp = pd_contacts.shape
    Bg, Hg, Wg = gt_contacts.shape
    assert B == Bg and Hg <= Hp and Wg <= Wp
    N = Hg * Wg

    # Lane-dense layout: crop to the gt shape and flatten spatial dims.  Under jit,
    # allow_input_fusion lets XLA fuse this slice+reshape into the pallas operand
    # instead of materializing an extra HBM copy of pd.
    pd2d = pd_contacts[:, :Hg, :Wg].reshape(B, N)
    gt2d = gt_contacts.reshape(B, N)

    itemsize = max(pd2d.dtype.itemsize, gt2d.dtype.itemsize)

    # ~4 MiB per input block (16 MiB total double-buffered): amortizes the
    # ~0.35 us/step fixed cost to <10% even on v7x's 3.2 TB/s HBM, while staying
    # inside every generation's VMEM once vmem_limit_bytes is raised below.
    bt = (4 * 1024 * 1024) // max(1, N * itemsize)
    bt = max(8, min(bt, 4096))
    bt = (bt // 8) * 8
    if B >= 16:
        # At least two blocks on the "parallel" axis so v7x's two TCs both get work.
        bt = min(bt, _round_up(pl.cdiv(B, 2), 8))
    bt = min(bt, _round_up(B, 8))
    if bt >= B:
        bt = B  # single block covering the whole batch: exact extent, no masking
    g = pl.cdiv(B, bt)
    mask_rows = (g * bt != B)  # ragged last block handled in-kernel (no jnp.pad pass)

    n_lane_groups = (N // 128) if (N % 128 == 0) else None
    if n_lane_groups is not None:
        out_shape = jax.ShapeDtypeStruct((g, 1, 128), jnp.float32)
        out_spec = pl.BlockSpec((1, 1, 128), lambda i: (i, 0, 0))
    else:
        out_shape = jax.ShapeDtypeStruct((g, 1, 1), jnp.float32)
        out_spec = pl.BlockSpec((1, 1, 1), lambda i: (i, 0, 0))

    # TODO(synk): for very large maps (Hg*Wg >~ 512*512) even an 8-row full-N block
    # exceeds the VMEM budget; add a second lane-tiling grid axis (multiples of 128)
    # with per-(row-block, lane-block) partial slots instead of growing VMEM further.
    in_block_bytes = bt * N * (pd2d.dtype.itemsize + gt2d.dtype.itemsize)
    vmem_limit = int(min(60 * 1024 * 1024,
                         max(32 * 1024 * 1024, 2 * in_block_bytes + (1 << 20))))

    kernel = _make_kernel(bt, B, n_lane_groups, mask_rows)

    partial = pl.pallas_call(
        kernel,
        out_shape=out_shape,
        grid_spec=pltpu.PrefetchScalarGridSpec(
            num_scalar_prefetch=0,
            grid=(g,),
            in_specs=[
                pl.BlockSpec((bt, N), lambda i: (i, 0)),
                pl.BlockSpec((bt, N), lambda i: (i, 0)),
            ],
            out_specs=out_spec,
        ),
        compiler_params=pltpu.CompilerParams(
            dimension_semantics=("parallel",),     # independent partial sums per step
            allow_input_fusion=[True, True],       # fuse crop/reshape into operands
            vmem_limit_bytes=vmem_limit,
        ),
    )(pd2d, gt2d)

    # Finish in XLA: per-item mean then batch mean == global sum / (B * Hg * Wg)
    # because every item shares the same (Hg, Wg) (enforced by the gt shape).
    return jnp.sum(partial) * jnp.float32(1.0 / (B * N))


if __name__ == "__main__":
    key = jax.random.PRNGKey(0)
    k1, k2 = jax.random.split(key)

    B, Hp, Wp = 2, 24, 24     # prediction matrices (per-item 2D, batched -> 3D)
    Hg, Wg = 16, 16           # gt contact maps (smaller; prediction is cropped)

    pd_contacts = jax.random.normal(k1, (B, Hp, Wp), dtype=jnp.float32)
    # "multi-label binary (int rather than binary)" -> small non-negative ints as floats
    gt_contacts = jax.random.randint(k2, (B, Hg, Wg), 0, 3).astype(jnp.float32)

    loss_fn = jax.jit(distance_prediction_loss)
    loss = loss_fn(pd_contacts, gt_contacts)
    jax.block_until_ready(loss)

    # pure-JAX reference
    pd_crop = pd_contacts[:, :Hg, :Wg]
    ref = jnp.mean(jnp.mean((pd_crop - gt_contacts) ** 2, axis=(1, 2)))

    assert jnp.allclose(loss, ref, rtol=1e-5, atol=1e-5), (loss, ref)
    print("KERNEL_OK")
</pallas_src>

<mosaic_0001>
module attributes {stable_mosaic.version = 11 : i64} {
  func.func @kernel(%arg0: i32, %arg1: memref<2x256xf32, #tpu.memory_space<vmem>>, %arg2: memref<2x256xf32, #tpu.memory_space<vmem>>, %arg3: memref<1x1x128xf32, #tpu.memory_space<vmem>>) attributes {dimension_semantics = [#tpu.dimension_semantics<parallel>], iteration_bounds = array<i64: 1>, scalar_prefetch = 0 : i64, scratch_operands = 0 : i64, tpu.core_type = #tpu.core_type<tc>, window_params = [{transform_indices = @transform_0, window_bounds = array<i64: 2, 256>}, {transform_indices = @transform_1, window_bounds = array<i64: 2, 256>}, {transform_indices = @transform_2, window_bounds = array<i64: 1, 1, 128>}]} {
    %c0 = arith.constant 0 : index
    %c0_0 = arith.constant 0 : index
    %0 = vector.load %arg1[%c0, %c0_0] : memref<2x256xf32, #tpu.memory_space<vmem>>, vector<2x256xf32>
    %c0_1 = arith.constant 0 : index
    %c0_2 = arith.constant 0 : index
    %1 = vector.load %arg2[%c0_1, %c0_2] : memref<2x256xf32, #tpu.memory_space<vmem>>, vector<2x256xf32>
    %2 = arith.subf %0, %1 : vector<2x256xf32>
    %3 = arith.mulf %2, %2 : vector<2x256xf32>
    %4 = vector.extract_strided_slice %3 {offsets = [0, 0], sizes = [2, 128], strides = [1, 1]} : vector<2x256xf32> to vector<2x128xf32>
    %5 = vector.extract_strided_slice %3 {offsets = [0, 128], sizes = [2, 128], strides = [1, 1]} : vector<2x256xf32> to vector<2x128xf32>
    %6 = arith.addf %4, %5 : vector<2x128xf32>
    %cst = arith.constant dense<0.000000e+00> : vector<128xf32>
    %7 = vector.multi_reduction <add>, %6, %cst [0] : vector<2x128xf32> to vector<128xf32>
    %8 = vector.shape_cast %7 : vector<128xf32> to vector<1x128xf32>
    %9 = vector.shape_cast %8 : vector<1x128xf32> to vector<1x1x128xf32>
    %c0_3 = arith.constant 0 : index
    %c0_4 = arith.constant 0 : index
    %c0_5 = arith.constant 0 : index
    %10 = vector.load %arg3[%c0_3, %c0_4, %c0_5] : memref<1x1x128xf32, #tpu.memory_space<vmem>>, vector<1x1x128xf32>
    tpu.vector_store %arg3[%c0_3, %c0_4, %c0_5], %9 {strides = array<i32>} : memref<1x1x128xf32, #tpu.memory_space<vmem>>, vector<1x1x128xf32>,
    return
  }
  func.func @transform_0(%arg0: i32) -> (i32, i32) {
    %c0_i32 = arith.constant 0 : i32
    %c0_i32_0 = arith.constant 0 : i32
    return %arg0, %c0_i32 : i32, i32
  }
  func.func @transform_1(%arg0: i32) -> (i32, i32) {
    %c0_i32 = arith.constant 0 : i32
    %c0_i32_0 = arith.constant 0 : i32
    return %arg0, %c0_i32 : i32, i32
  }
  func.func @transform_2(%arg0: i32) -> (i32, i32, i32) {
    %c0_i32 = arith.constant 0 : i32
    %c0_i32_0 = arith.constant 0 : i32
    %c0_i32_1 = arith.constant 0 : i32
    return %arg0, %c0_i32, %c0_i32_0 : i32, i32, i32
  }
}

</mosaic_0001>

<bundles_post_ra>
// kernel: distance_prediction_loss.1
= control target key start
LH: loop header
LB: loop body
LE: loop exit
PB: predicated region body
PF: predicated region fallthrough
CT: control target
= control target key end

     0   :  { %vm19_vm0 = vcmask 1041408   ;;  %s56_s0 = inlined_call_operand.vmem [shape: f32[2,256], index: 0, kind: input, shape index: {}]   ;;  %s57_s1 = inlined_call_operand.vmem [shape: f32[2,256], index: 1, kind: input, shape index: {}]   ;;  %s58_s2 = inlined_call_operand.vmem [shape: f32[1,1,128], index: 2, kind: output, shape index: {}]  }
   0x1   :  { %v11_v0 = vld [vmem:[%s56_s0] sm:$0xf] }
   0x2   :  { %v12_v1 = vld [vmem:[%s57_s1] sm:$0xf] }
   0x3   :  { %v13_v2 = vsub.f32 %v11_v0, %v12_v1 }
   0x5   :  { %v14_v3 = vmul.f32 %v13_v2, %v13_v2 }
   0x7   :  { %v16_v4 = vrot.slane %v14_v3, 2 }
   0x9   :  { %v18_v5 = vadd.f32 %v16_v4, %v14_v3 }
   0xb   :  { %v20_v6 = vsel %vm19_vm0, %v18_v5, 0.0 }
   0xc   :  { %v21_v7 = vrot.slane %v20_v6, 4 }
   0xe   :  { %v22_v8 = vadd.f32 %v21_v7, %v20_v6 }
  0x10   :  { %v23_v9 = vrot.slane %v22_v8, 2 }
  0x12   :  { %v24_v10 = vadd.f32 %v23_v9, %v22_v8 }
  0x14   :  { %v25_v11 = vrot.slane %v24_v10, 1 }
  0x16   :  { %v26_v12 = vadd.f32 %v25_v11, %v24_v10 }
  0x18   :  { %27 = vst [vmem:[%s58_s2] sm:$0x1] %v26_v12 }

</bundles_post_ra>
